<compile_context>
chip_gen: v5e
topology: v5e:2x2
jax: 0.10.0
libtpu: 0.0.40
codegen_flags: <defaults>
</compile_context>

<pallas_src>
import functools

import jax
import jax.numpy as jnp
from jax.experimental import pallas as pl
from jax.experimental.pallas import tpu as pltpu


# -----------------------------------------------------------------------------
# Kernel: additive self-attention pooling over the K neighbour axis
# -----------------------------------------------------------------------------
def self_att_kernel(h_ref, a_ref, b_ref, out_ref):
    # h_ref  : (TN, K, E)  tile of neighbour embeddings (rows = flattened b*l)
    # a_ref  : (E, D)      attention projection  (resident across the grid)
    # b_ref  : (1, D)      attention scoring vector, row layout (resident)
    # out_ref: (TN, E)     pooled embeddings
    h = h_ref[...]                                     # (TN, K, E)
    TN, K, E = h.shape

    # e = tanh(h @ a) @ b  -- one big (TN*K, E) @ (E, D) MXU matmul per tile.
    hf = h.reshape(TN * K, E)
    t = jnp.tanh(jnp.dot(hf, a_ref[...], preferred_element_type=jnp.float32))  # (TN*K, D)
    e = jnp.sum(t * b_ref[...], axis=-1, keepdims=True)                        # (TN*K, 1)
    e = e.reshape(TN, K, 1)                                                     # (TN, K, 1)

    # softmax over the K neighbours (numerically stable).
    m = jnp.max(e, axis=1, keepdims=True)              # (TN, 1, 1)
    p = jnp.exp(e - m)                                 # (TN, K, 1)
    alpha = p / jnp.sum(p, axis=1, keepdims=True)      # (TN, K, 1)

    # weighted sum of neighbour embeddings.
    out_ref[...] = jnp.sum(alpha * h, axis=1)          # (TN, E)


# -----------------------------------------------------------------------------
# Wrapper (glue: neighbour / embedding gathers, row flattening, padding)
# -----------------------------------------------------------------------------
def _round_up(x, m):
    return ((x + m - 1) // m) * m


@functools.partial(jax.jit, static_argnames=("row_tile",))
def conceptnet_encoder_forward(params, neighbors_table, conceptnet_text_vec,
                               *, row_tile=128):
    """forward(conceptnet_text_vec) -> att_emb of shape (B, L, E)."""
    B, L = conceptnet_text_vec.shape
    K = neighbors_table.shape[1]
    E = params["conceptnet_emb"].shape[1]
    D = params["att_a"].shape[1]

    # Data-dependent gathers (JAX glue; see header note).
    neigh_ids = jnp.take(neighbors_table, conceptnet_text_vec, axis=0)   # (B, L, K)
    h = jnp.take(params["conceptnet_emb"], neigh_ids, axis=0)            # (B, L, K, E)
    h = h.astype(jnp.float32)

    # Flatten (b, l) rows; pad so the row tile divides evenly and stays a
    # multiple of 8 (sublane alignment for the (TN, E) output block).
    N = B * L
    TN = min(row_tile, _round_up(N, 8))
    N_pad = pl.cdiv(N, TN) * TN
    h_rows = h.reshape(N, K, E)
    if N_pad != N:
        h_rows = jnp.pad(h_rows, ((0, N_pad - N), (0, 0), (0, 0)))
    b_row = params["att_b"].reshape(1, D)                                # (1, D)

    grid = (N_pad // TN,)
    out_flat = pl.pallas_call(
        self_att_kernel,
        out_shape=jax.ShapeDtypeStruct((N_pad, E), jnp.float32),
        grid=grid,
        in_specs=[
            pl.BlockSpec((TN, K, E), lambda i: (i, 0, 0)),   # streamed row tiles
            pl.BlockSpec((E, D), lambda i: (0, 0)),          # resident weight
            pl.BlockSpec((1, D), lambda i: (0, 0)),          # resident weight
        ],
        out_specs=pl.BlockSpec((TN, E), lambda i: (i, 0)),
        compiler_params=pltpu.CompilerParams(dimension_semantics=("parallel",)),
    )(h_rows, params["att_a"], b_row)

    return out_flat[:N].reshape(B, L, E)


# -----------------------------------------------------------------------------
# Pure-JAX reference (same parameterization) for a correctness cross-check.
# -----------------------------------------------------------------------------
def reference_forward(params, neighbors_table, conceptnet_text_vec):
    neigh_ids = jnp.take(neighbors_table, conceptnet_text_vec, axis=0)   # (B, L, K)
    h = jnp.take(params["conceptnet_emb"], neigh_ids, axis=0)            # (B, L, K, E)
    t = jnp.tanh(h @ params["att_a"])                                    # (B, L, K, D)
    e = t @ params["att_b"]                                              # (B, L, K, 1)
    alpha = jax.nn.softmax(e, axis=-2)                                   # over K
    out = jnp.squeeze(jnp.swapaxes(alpha, -1, -2) @ h, axis=-2)          # (B, L, E)
    return out


def make_params(key, vocab, emb, da):
    k_emb, k_a, k_b = jax.random.split(key, 3)
    scale = 0.1
    return {
        "conceptnet_emb": jax.random.normal(k_emb, (vocab, emb), jnp.float32) * scale,
        "att_a": jax.random.normal(k_a, (emb, da), jnp.float32) * scale,
        "att_b": jax.random.normal(k_b, (da, 1), jnp.float32) * scale,
    }


if __name__ == "__main__":
    # Small shapes consistent with the module:
    #   batch=2, seq=8 concept ids per example, topk=8 neighbours,
    #   emb_size=32 (da = emb_size), conceptnet_len=64.
    B, L, K, E, V = 2, 8, 8, 32, 64
    D = E

    key = jax.random.PRNGKey(0)
    kp, knb, kx = jax.random.split(key, 3)

    params = make_params(kp, V, E, D)
    neighbors_table = jax.random.randint(knb, (V, K), 0, V, dtype=jnp.int32)
    conceptnet_text_vec = jax.random.randint(kx, (B, L), 0, V, dtype=jnp.int32)

    att_emb = conceptnet_encoder_forward(params, neighbors_table, conceptnet_text_vec)
    jax.block_until_ready(att_emb)

    ref = reference_forward(params, neighbors_table, conceptnet_text_vec)
    assert att_emb.shape == (B, L, E)
    assert jnp.allclose(att_emb, ref, rtol=1e-4, atol=1e-4), "attention pooling mismatch"

    print("KERNEL_OK")
</pallas_src>

<mosaic_0001>
module attributes {stable_mosaic.version = 11 : i64} {
  func.func @self_att_kernel(%arg0: i32, %arg1: memref<16x8x32xf32, #tpu.memory_space<vmem>>, %arg2: memref<32x32xf32, #tpu.memory_space<vmem>>, %arg3: memref<1x32xf32, #tpu.memory_space<vmem>>, %arg4: memref<16x32xf32, #tpu.memory_space<vmem>>) attributes {dimension_semantics = [#tpu.dimension_semantics<parallel>], iteration_bounds = array<i64: 1>, scalar_prefetch = 0 : i64, scratch_operands = 0 : i64, tpu.core_type = #tpu.core_type<tc>, window_params = [{transform_indices = @transform_0, window_bounds = array<i64: 16, 8, 32>}, {pipeline_mode = #tpu.pipeline_mode<synchronous>, transform_indices = @transform_1, window_bounds = array<i64: 32, 32>}, {pipeline_mode = #tpu.pipeline_mode<synchronous>, transform_indices = @transform_2, window_bounds = array<i64: 1, 32>}, {transform_indices = @transform_3, window_bounds = array<i64: 16, 32>}]} {
    %c0 = arith.constant 0 : index
    %c0_0 = arith.constant 0 : index
    %c0_1 = arith.constant 0 : index
    %0 = vector.load %arg1[%c0, %c0_0, %c0_1] : memref<16x8x32xf32, #tpu.memory_space<vmem>>, vector<16x8x32xf32>
    %1 = vector.shape_cast %0 : vector<16x8x32xf32> to vector<128x32xf32>
    %c0_2 = arith.constant 0 : index
    %c0_3 = arith.constant 0 : index
    %2 = vector.load %arg2[%c0_2, %c0_3] : memref<32x32xf32, #tpu.memory_space<vmem>>, vector<32x32xf32>
    %cst = arith.constant dense<0.000000e+00> : vector<128x32xf32>
    %3 = tpu.matmul %1, %2, %cst {dimension_numbers = #tpu.dot_dimension_numbers<[1], [0], [0], [1], [0, 0, 1, 1], [], []>} : vector<128x32xf32>, vector<32x32xf32>, vector<128x32xf32> -> vector<128x32xf32>
    %4 = math.tanh %3 : vector<128x32xf32>
    %c0_4 = arith.constant 0 : index
    %c0_5 = arith.constant 0 : index
    %5 = vector.load %arg3[%c0_4, %c0_5] : memref<1x32xf32, #tpu.memory_space<vmem>>, vector<1x32xf32>
    %6 = vector.broadcast %5 : vector<1x32xf32> to vector<128x32xf32>
    %7 = arith.mulf %4, %6 : vector<128x32xf32>
    %cst_6 = arith.constant dense<0.000000e+00> : vector<128xf32>
    %8 = vector.multi_reduction <add>, %7, %cst_6 [1] : vector<128x32xf32> to vector<128xf32>
    %9 = vector.shape_cast %8 : vector<128xf32> to vector<128x1xf32>
    %10 = vector.shape_cast %9 : vector<128x1xf32> to vector<16x8x1xf32>
    %cst_7 = arith.constant dense<0xFF800000> : vector<16x1xf32>
    %11 = vector.multi_reduction <maximumf>, %10, %cst_7 [1] : vector<16x8x1xf32> to vector<16x1xf32>
    %12 = vector.shape_cast %11 : vector<16x1xf32> to vector<16x1x1xf32>
    %13 = vector.broadcast %12 : vector<16x1x1xf32> to vector<16x8x1xf32>
    %14 = arith.subf %10, %13 : vector<16x8x1xf32>
    %15 = math.exp %14 : vector<16x8x1xf32>
    %cst_8 = arith.constant dense<0.000000e+00> : vector<16x1xf32>
    %16 = vector.multi_reduction <add>, %15, %cst_8 [1] : vector<16x8x1xf32> to vector<16x1xf32>
    %17 = vector.shape_cast %16 : vector<16x1xf32> to vector<16x1x1xf32>
    %18 = vector.broadcast %17 : vector<16x1x1xf32> to vector<16x8x1xf32>
    %19 = arith.divf %15, %18 : vector<16x8x1xf32>
    %20 = vector.broadcast %19 : vector<16x8x1xf32> to vector<16x8x32xf32>
    %21 = arith.mulf %20, %0 : vector<16x8x32xf32>
    %cst_9 = arith.constant dense<0.000000e+00> : vector<16x32xf32>
    %22 = vector.multi_reduction <add>, %21, %cst_9 [1] : vector<16x8x32xf32> to vector<16x32xf32>
    %c0_10 = arith.constant 0 : index
    %c0_11 = arith.constant 0 : index
    %23 = vector.load %arg4[%c0_10, %c0_11] : memref<16x32xf32, #tpu.memory_space<vmem>>, vector<16x32xf32>
    tpu.vector_store %arg4[%c0_10, %c0_11], %22 {strides = array<i32>} : memref<16x32xf32, #tpu.memory_space<vmem>>, vector<16x32xf32>,
    return
  }
  func.func @transform_0(%arg0: i32) -> (i32, i32, i32) {
    %c0_i32 = arith.constant 0 : i32
    %c0_i32_0 = arith.constant 0 : i32
    %c0_i32_1 = arith.constant 0 : i32
    return %arg0, %c0_i32, %c0_i32_0 : i32, i32, i32
  }
  func.func @transform_1(%arg0: i32) -> (i32, i32) {
    %c0_i32 = arith.constant 0 : i32
    %c0_i32_0 = arith.constant 0 : i32
    %c0_i32_1 = arith.constant 0 : i32
    return %c0_i32, %c0_i32_0 : i32, i32
  }
  func.func @transform_2(%arg0: i32) -> (i32, i32) {
    %c0_i32 = arith.constant 0 : i32
    %c0_i32_0 = arith.constant 0 : i32
    %c0_i32_1 = arith.constant 0 : i32
    return %c0_i32, %c0_i32_0 : i32, i32
  }
  func.func @transform_3(%arg0: i32) -> (i32, i32) {
    %c0_i32 = arith.constant 0 : i32
    %c0_i32_0 = arith.constant 0 : i32
    return %arg0, %c0_i32 : i32, i32
  }
}

</mosaic_0001>

<bundles_post_ra>
// kernel: conceptnet_encoder_forward.1
= control target key start
LH: loop header
LB: loop body
LE: loop exit
PB: predicated region body
PF: predicated region fallthrough
CT: control target
= control target key end

     0   :  { %vm35_vm0 = vcmask 261120   ;;  %s1783_s0 = inlined_call_operand.vmem [shape: f32[16,8,32], index: 0, kind: input, shape index: {}]   ;;  %s1784_s1 = inlined_call_operand.vmem [shape: f32[32,32], index: 1, kind: input, shape index: {}]   ;;  %s1785_s2 = inlined_call_operand.vmem [shape: f32[1,32], index: 2, kind: input, shape index: {}]   ;;  %s1786_s3 = inlined_call_operand.hbm [shape: f32[16,32], index: 3, kind: output, shape index: {}]  }
   0x1   :  { %v34_v0 = vld [vmem:[%s1784_s1 + $0x18] sm:$0xff]  ;;  %v33_v1 = vld [vmem:[%s1784_s1 + $0x10] sm:$0xff]  ;;  %v32_v2 = vld [vmem:[%s1784_s1 + $0x8] sm:$0xff] }
   0x2   :  { %96 = vmatpush.msra.mxu0 %v34_v0  ;;  %916 = vmatpush.msra.mxu1 %v34_v0  ;;  %v31_v3 = vld [vmem:[%s1784_s1] sm:$0xff] }
   0x3   :  { %917 = vmatpush.msra.mxu2 %v34_v0  ;;  %918 = vmatpush.msra.mxu3 %v34_v0  ;;  %v1103_v4 = vld [vmem:[%s1783_s0] sm:$0xff] }
   0x4   :  { %97 = vmatpush.msra.mxu0 %v33_v1  ;;  %919 = vmatpush.msra.mxu1 %v33_v1  ;;  %v1108_v5 = vld [vmem:[%s1783_s0 + $0x20] sm:$0xff] }
   0x5   :  { %920 = vmatpush.msra.mxu2 %v33_v1  ;;  %921 = vmatpush.msra.mxu3 %v33_v1  ;;  %v1113_v6 = vld [vmem:[%s1783_s0 + $0x40] sm:$0xff] }
   0x6   :  { %98 = vmatpush.msra.mxu0 %v32_v2  ;;  %922 = vmatpush.msra.mxu1 %v32_v2  ;;  %v1118_v7 = vld [vmem:[%s1783_s0 + $0x60] sm:$0xff] }
   0x7   :  { %923 = vmatpush.msra.mxu2 %v32_v2  ;;  %924 = vmatpush.msra.mxu3 %v32_v2 }
   0x8   :  { %99 = vmatpush.msra.mxu0 %v31_v3  ;;  %925 = vmatpush.msra.mxu1 %v31_v3 }
   0x9   :  { %8 = vsyncpa [#allocation3], 0  ;;  %926 = vmatpush.msra.mxu2 %v31_v3  ;;  %927 = vmatpush.msra.mxu3 %v31_v3  ;;  %v1131_v8 = vld [vmem:[%s1783_s0 + $0x8] sm:$0xff]  ;;  %v17_v12 = vld [vmem:[%s1783_s0 + $0x10] sm:$0xff]  ;;  %s888_s22 = sshll.u32 %s1786_s3, 4  ;;  %s1066_s23 = smov 128   ;;  %s889_s22 = int_to_ptr.hbm [resolvable:$true] %s888_s22 }
   0xa   :  { %900 = vmatmul.msk.f32.vlgmr.msra.gmra.mxu0 %vm35_vm0, %v1103_v4  ;;  %904 = vmatmul.msk.f32.vlgmr.msra.gmra.mxu1 %vm35_vm0, %v1108_v5  ;;  %v20_v9 = vld [vmem:[%s1783_s0 + $0x28] sm:$0xff]  ;;  %v21_v13 = vld [vmem:[%s1783_s0 + $0x30] sm:$0xff]  ;;  %v18_v16 = vld [vmem:[%s1783_s0 + $0x18] sm:$0xff]  ;;  %s1067_s24 = smov 8  }
   0xb   :  { %908 = vmatmul.msk.f32.vlgmr.msra.gmra.mxu2 %vm35_vm0, %v1113_v6  ;;  %912 = vmatmul.msk.f32.vlgmr.msra.gmra.mxu3 %vm35_vm0, %v1118_v7  ;;  %v24_v10 = vld [vmem:[%s1783_s0 + $0x48] sm:$0xff]  ;;  %v25_v14 = vld [vmem:[%s1783_s0 + $0x50] sm:$0xff]  ;;  %v22_v17 = vld [vmem:[%s1783_s0 + $0x38] sm:$0xff] }
   0xc   :  { %v28_v11 = vld [vmem:[%s1783_s0 + $0x68] sm:$0xff]  ;;  %v29_v15 = vld [vmem:[%s1783_s0 + $0x70] sm:$0xff]  ;;  %v26_v18 = vld [vmem:[%s1783_s0 + $0x58] sm:$0xff] }
   0xd   :  { %v30_v19 = vld [vmem:[%s1783_s0 + $0x78] sm:$0xff]  ;;  %v1182_v22 = vld [vmem:[%s1785_s2] ss:$0 sm:$0xff] }
  0x12   :  { %901 = vmatmul.msk.f32.gmra.mxu0 %vm35_vm0, %v1131_v8  ;;  %905 = vmatmul.msk.f32.gmra.mxu1 %vm35_vm0, %v20_v9 }
  0x13   :  { %909 = vmatmul.msk.f32.gmra.mxu2 %vm35_vm0, %v24_v10  ;;  %913 = vmatmul.msk.f32.gmra.mxu3 %vm35_vm0, %v28_v11 }
  0x1a   :  { %902 = vmatmul.msk.f32.gmra.mxu0 %vm35_vm0, %v17_v12  ;;  %906 = vmatmul.msk.f32.gmra.mxu1 %vm35_vm0, %v21_v13 }
  0x1b   :  { %910 = vmatmul.msk.f32.gmra.mxu2 %vm35_vm0, %v25_v14  ;;  %914 = vmatmul.msk.f32.gmra.mxu3 %vm35_vm0, %v29_v15 }
  0x22   :  { %903 = vmatmul.msk.f32.gmra.mxu0 %vm35_vm0, %v18_v16  ;;  %907 = vmatmul.msk.f32.gmra.mxu1 %vm35_vm0, %v22_v17 }
  0x23   :  { %911 = vmatmul.msk.f32.gmra.mxu2 %vm35_vm0, %v26_v18  ;;  %915 = vmatmul.msk.f32.gmra.mxu3 %vm35_vm0, %v30_v19 }
  0x87   :  { %v101_v20 = vpop.f32.mrf.mxu0  ;;  %v113_v21 = vpop.f32.mrf.mxu1 }
  0x88   :  { %932 = vtanh.f32 %v101_v20 }
  0x89   :  { %934 = vtanh.f32 %v113_v21 }
  0x8e   :  { %v933_v23 = vpop.eup %932  ;;  %v125_v24 = vpop.f32.mrf.mxu2 }
  0x8f   :  { %v137_v25 = vpop.f32.mrf.mxu3  ;;  %v935_v26 = vpop.eup %934  ;;  %936 = vtanh.f32 %v125_v24  ;;  %v169_v27 = vmul.f32 %v933_v23, %v1182_v22 }
  0x90   :  { %v104_v28 = vpop.f32.mrf.mxu0  ;;  %v116_v29 = vpop.f32.mrf.mxu1  ;;  %938 = vtanh.f32 %v137_v25  ;;  %v173_v30 = vmul.f32 %v935_v26, %v1182_v22 }
  0x91   :  { %v185_v31 = vsel %vm35_vm0, %v169_v27, 0.0  ;;  %940 = vtanh.f32 %v104_v28 }
  0x92   :  { %v197_v32 = vsel %vm35_vm0, %v173_v30, 0.0  ;;  %186 = vadd.xlane.f32.xlu0 %v185_v31  ;;  %942 = vtanh.f32 %v116_v29 }
  0x93   :  { %198 = vadd.xlane.f32.xlu2 %v197_v32 }
  0x95   :  { %v937_v33 = vpop.eup %936 }
  0x96   :  { %v939_v34 = vpop.eup %938  ;;  %v128_v35 = vpop.f32.mrf.mxu2  ;;  %v177_v37 = vmul.f32 %v937_v33, %v1182_v22 }
  0x97   :  { %v140_v36 = vpop.f32.mrf.mxu3  ;;  %v941_v38 = vpop.eup %940  ;;  %v181_v39 = vmul.f32 %v939_v34, %v1182_v22 }
  0x98   :  { %v107_v40 = vpop.f32.mrf.mxu0  ;;  %v119_v41 = vpop.f32.mrf.mxu1  ;;  %944 = vtanh.f32 %v140_v36  ;;  %v209_v43 = vsel %vm35_vm0, %v177_v37, 0.0  ;;  %v170_v46 = vmul.f32 %v941_v38, %v1182_v22 }
  0x99   :  { %v943_v42 = vpop.eup %942  ;;  %210 = vadd.xlane.f32.xlu1 %v209_v43  ;;  %v221_v44 = vsel %vm35_vm0, %v181_v39, 0.0  ;;  %946 = vtanh.f32 %v107_v40 }
  0x9a   :  { %222 = vadd.xlane.f32.xlu0 %v221_v44  ;;  %948 = vtanh.f32 %v119_v41  ;;  %v174_v45 = vmul.f32 %v943_v42, %v1182_v22  ;;  %v188_v53 = vsel %vm35_vm0, %v170_v46, 0.0 }
  0x9b   :  { %950 = vtanh.f32 %v128_v35 }
  0x9c   :  { %v200_v49 = vsel %vm35_vm0, %v174_v45, 0.0 }
  0x9e   :  { %v945_v47 = vpop.eup %944  ;;  %v131_v48 = vpop.f32.mrf.mxu2 }
  0x9f   :  { %v143_v50 = vpop.f32.mrf.mxu3  ;;  %v947_v51 = vpop.eup %946  ;;  %v182_v52 = vmul.f32 %v945_v47, %v1182_v22 }
  0xa0   :  { %v110_v54 = vpop.f32.mrf.mxu0  ;;  %v949_v55 = vpop.eup %948  ;;  %v171_v58 = vmul.f32 %v947_v51, %v1182_v22 }
  0xa1   :  { %v951_v56 = vpop.eup %950  ;;  %v224_v57 = vsel %vm35_vm0, %v182_v52, 0.0  ;;  %201 = vadd.xlane.f32.xlu1 %v200_v49  ;;  %952 = vtanh.f32 %v110_v54  ;;  %v175_v59 = vmul.f32 %v949_v55, %v1182_v22  ;;  %v122_v62 = vpop.f32.mrf.mxu1 }
  0xa2   :  { %225 = vadd.xlane.f32.xlu2 %v224_v57  ;;  %189 = vadd.xlane.f32.xlu0 %v188_v53  ;;  %954 = vtanh.f32 %v131_v48  ;;  %v178_v60 = vmul.f32 %v951_v56, %v1182_v22  ;;  %v191_v63 = vsel %vm35_vm0, %v171_v58, 0.0 }
  0xa3   :  { %v203_v0 = vsel %vm35_vm0, %v175_v59, 0.0 }
  0xa4   :  { %v212_v3 = vsel %vm35_vm0, %v178_v60, 0.0 }
  0xa6   :  { %v134_v61 = vpop.f32.mrf.mxu2 }
  0xa7   :  { %956 = vtanh.f32 %v134_v61  ;;  %v146_v1 = vpop.f32.mrf.mxu3  ;;  %v953_v2 = vpop.eup %952 }
  0xa8   :  { %958 = vtanh.f32 %v122_v62  ;;  %v955_v9 = vpop.eup %954  ;;  %v172_v10 = vmul.f32 %v953_v2, %v1182_v22 }
  0xa9   :  { %213 = vadd.xlane.f32.xlu1 %v212_v3  ;;  %960 = vtanh.f32 %v146_v1  ;;  %v179_v12 = vmul.f32 %v955_v9, %v1182_v22 }
  0xaa   :  { %192 = vadd.xlane.f32.xlu2 %v191_v63  ;;  %204 = vadd.xlane.f32.xlu0 %v203_v0  ;;  %962 = vtanh.f32 %v143_v50  ;;  %v194_v15 = vsel %vm35_vm0, %v172_v10, 0.0 }
  0xab   :  { %v215_v19 = vsel %vm35_vm0, %v179_v12, 0.0 }
  0xad   :  { %v957_v11 = vpop.eup %956 }
  0xae   :  { %v180_v13 = vmul.f32 %v957_v11, %v1182_v22  ;;  %v959_v14 = vpop.eup %958 }
  0xaf   :  { %v961_v16 = vpop.eup %960  ;;  %v176_v20 = vmul.f32 %v959_v14, %v1182_v22 }
  0xb0   :  { %v218_v17 = vsel %vm35_vm0, %v180_v13, 0.0  ;;  %v963_v18 = vpop.eup %962  ;;  %v184_v21 = vmul.f32 %v961_v16, %v1182_v22 }
  0xb1   :  { %219 = vadd.xlane.f32.xlu1 %v218_v17  ;;  %v183_v23 = vmul.f32 %v963_v18, %v1182_v22  ;;  %v206_v24 = vsel %vm35_vm0, %v176_v20, 0.0 }
  0xb2   :  { %216 = vadd.xlane.f32.xlu2 %v215_v19  ;;  %195 = vadd.xlane.f32.xlu0 %v194_v15  ;;  %v230_v25 = vsel %vm35_vm0, %v184_v21, 0.0 }
  0xb3   :  { %v227_v26 = vsel %vm35_vm0, %v183_v23, 0.0 }
  0xb9   :  { %228 = vadd.xlane.f32.xlu1 %v227_v26 }
  0xba   :  { %207 = vadd.xlane.f32.xlu2 %v206_v24  ;;  %231 = vadd.xlane.f32.xlu0 %v230_v25 }
 0x105   :  { %v187_v27 = vpop.xlane.xlu0 %186 }
 0x106   :  { %v199_v28 = vpop.xlane.xlu2 %198  ;;  %v233_v29 = vrot.slane %v187_v27, 4 }
 0x107   :  { %v257_v30 = vrot.slane %v199_v28, 4 }
 0x108   :  { %v234_v31 = vmax.f32 %v187_v27, %v233_v29 }
 0x109   :  { %v258_v32 = vmax.f32 %v199_v28, %v257_v30 }
 0x10a   :  { %v235_v33 = vrot.slane %v234_v31, 2 }
 0x10b   :  { %v259_v34 = vrot.slane %v258_v32, 2 }
 0x10c   :  { %v236_v35 = vmax.f32 %v234_v31, %v235_v33  ;;  %v211_v36 = vpop.xlane.xlu1 %210 }
 0x10d   :  { %v260_v22 = vmax.f32 %v258_v32, %v259_v34  ;;  %v281_v37 = vrot.slane %v211_v36, 4  ;;  %v223_v38 = vpop.xlane.xlu0 %222 }
 0x10e   :  { %v237_v39 = vrot.slane %v236_v35, 1  ;;  %v305_v40 = vrot.slane %v223_v38, 4 }
 0x10f   :  { %v261_v41 = vrot.slane %v260_v22, 1  ;;  %v282_v42 = vmax.f32 %v211_v36, %v281_v37 }
 0x110   :  { %v238_v43 = vmax.f32 %v236_v35, %v237_v39  ;;  %v306_v44 = vmax.f32 %v223_v38, %v305_v40 }
 0x111   :  { %v262_v45 = vmax.f32 %v260_v22, %v261_v41  ;;  %v283_v46 = vrot.slane %v282_v42, 2 }
 0x112   :  { %v329_v47 = vsub.f32 %v187_v27, %v238_v43  ;;  %v307_v48 = vrot.slane %v306_v44, 2 }
 0x113   :  { %v333_v49 = vsub.f32 %v199_v28, %v262_v45  ;;  %v284_v50 = vmax.f32 %v282_v42, %v283_v46 }
 0x114   :  { %v345_v51 = vmul.f32 1.442695, %v329_v47  ;;  %v308_v52 = vmax.f32 %v306_v44, %v307_v48  ;;  %v202_v53 = vpop.xlane.xlu1 %201 }
 0x115   :  { %v353_v54 = vmul.f32 1.442695, %v333_v49  ;;  %v285_v55 = vrot.slane %v284_v50, 1  ;;  %v226_v56 = vpop.xlane.xlu2 %225  ;;  %v263_v57 = vrot.slane %v202_v53, 4  ;;  %v190_v58 = vpop.xlane.xlu0 %189 }
 0x116   :  { %964 = vpow2.f32 %v345_v51  ;;  %v309_v59 = vrot.slane %v308_v52, 1  ;;  %v311_v60 = vrot.slane %v226_v56, 4  ;;  %v239_v61 = vrot.slane %v190_v58, 4 }
 0x117   :  { %966 = vpow2.f32 %v353_v54  ;;  %v286_v62 = vmax.f32 %v284_v50, %v285_v55  ;;  %v264_v63 = vmax.f32 %v202_v53, %v263_v57 }
 0x118   :  { %v310_v0 = vmax.f32 %v308_v52, %v309_v59  ;;  %v312_v1 = vmax.f32 %v226_v56, %v311_v60  ;;  %v240_v2 = vmax.f32 %v190_v58, %v239_v61 }
 0x119   :  { %v337_v3 = vsub.f32 %v211_v36, %v286_v62  ;;  %v265_v9 = vrot.slane %v264_v63, 2 }
 0x11a   :  { %v341_v10 = vsub.f32 %v223_v38, %v310_v0  ;;  %v313_v11 = vrot.slane %v312_v1, 2  ;;  %v241_v12 = vrot.slane %v240_v2, 2 }
 0x11b   :  { %v361_v13 = vmul.f32 1.442695, %v337_v3  ;;  %v266_v14 = vmax.f32 %v264_v63, %v265_v9 }
 0x11c   :  { %v1216_v15 = vpop.eup %964  ;;  %v369_v16 = vmul.f32 1.442695, %v341_v10  ;;  %v314_v17 = vmax.f32 %v312_v1, %v313_v11  ;;  %v242_v18 = vmax.f32 %v240_v2, %v241_v12  ;;  %v1218_v19 = vpop.xlane.xlu1 %213 }
 0x11d   :  { %v1220_v20 = vpop.eup %966  ;;  %v377_v21 = vrot.slane %v1216_v15, 4  ;;  %968 = vpow2.f32 %v361_v13  ;;  %v267_v23 = vrot.slane %v266_v14, 1  ;;  %v287_v24 = vrot.slane %v1218_v19, 4  ;;  %v1244_v59 = vpop.xlane.xlu2 %192 }
 0x11e   :  { %v401_v25 = vrot.slane %v1220_v20, 4  ;;  %970 = vpow2.f32 %v369_v16  ;;  %v315_v26 = vrot.slane %v314_v17, 1  ;;  %v243_v27 = vrot.slane %v242_v18, 1 }
 0x11f   :  { %v378_v28 = vadd.f32 %v1216_v15, %v377_v21  ;;  %v268_v29 = vmax.f32 %v266_v14, %v267_v23  ;;  %v288_v37 = vmax.f32 %v1218_v19, %v287_v24  ;;  %v245_v3 = vrot.slane %v1244_v59, 4 }
 0x120   :  { %v402_v30 = vadd.f32 %v1220_v20, %v401_v25  ;;  %v316_v31 = vmax.f32 %v314_v17, %v315_v26  ;;  %v244_v32 = vmax.f32 %v242_v18, %v243_v27 }
 0x121   :  { %v379_v33 = vrot.slane %v378_v28, 2  ;;  %v334_v34 = vsub.f32 %v202_v53, %v268_v29  ;;  %v289_v50 = vrot.slane %v288_v37, 2  ;;  %v246_v23 = vmax.f32 %v1244_v59, %v245_v3  ;;  %v1283_v3 = vpop.xlane.xlu0 %204 }
 0x122   :  { %v403_v35 = vrot.slane %v402_v30, 2  ;;  %v342_v36 = vsub.f32 %v226_v56, %v316_v31  ;;  %v330_v22 = vsub.f32 %v190_v58, %v244_v32 }
 0x123   :  { %v1228_v38 = vpop.eup %968  ;;  %v380_v39 = vadd.f32 %v379_v33, %v378_v28  ;;  %v355_v40 = vmul.f32 1.442695, %v334_v34  ;;  %v290_v55 = vmax.f32 %v288_v37, %v289_v50  ;;  %v247_v33 = vrot.slane %v246_v23, 2 }
 0x124   :  { %v1230_v41 = vpop.eup %970  ;;  %v404_v42 = vadd.f32 %v403_v35, %v402_v30  ;;  %v425_v43 = vrot.slane %v1228_v38, 4  ;;  %v371_v44 = vmul.f32 1.442695, %v342_v36  ;;  %v347_v45 = vmul.f32 1.442695, %v330_v22 }
 0x125   :  { %v381_v46 = vrot.slane %v380_v39, 1  ;;  %v449_v47 = vrot.slane %v1230_v41, 4  ;;  %972 = vpow2.f32 %v355_v40  ;;  %v291_v0 = vrot.slane %v290_v55, 1 }
 0x126   :  { %v405_v48 = vrot.slane %v404_v42, 1  ;;  %v426_v49 = vadd.f32 %v1228_v38, %v425_v43  ;;  %974 = vpow2.f32 %v371_v44  ;;  %v248_v50 = vmax.f32 %v246_v23, %v247_v33 }
 0x127   :  { %v1235_v51 = vadd.f32 %v381_v46, %v380_v39  ;;  %v450_v52 = vadd.f32 %v1230_v41, %v449_v47  ;;  %976 = vpow2.f32 %v347_v45  ;;  %v292_v17 = vmax.f32 %v290_v55, %v291_v0 }
 0x128   :  { %v1238_v53 = vadd.f32 %v405_v48, %v404_v42  ;;  %v427_v54 = vrot.slane %v426_v49, 2 }
 0x129   :  { %978 = vrcp.f32 %v1235_v51  ;;  %v451_v57 = vrot.slane %v450_v52, 2  ;;  %v338_v30 = vsub.f32 %v1218_v19, %v292_v17  ;;  %v484_v31 = vand.u32 2147483648, %v1235_v51 }
 0x12a   :  { %980 = vrcp.f32 %v1238_v53  ;;  %v428_v56 = vadd.f32 %v427_v54, %v426_v49  ;;  %vm478_vm3 = vweird.f32 %v1235_v51  ;;  %v482_v36 = vand.u32 2147483647, %v1235_v51 }
 0x12b   :  { %v1242_v58 = vpop.eup %972  ;;  %v452_v62 = vadd.f32 %v451_v57, %v450_v52  ;;  %vm538_vm4 = vweird.f32 %v1238_v53  ;;  %v544_v22 = vand.u32 2147483648, %v1238_v53  ;;  %v542_v37 = vand.u32 2147483647, %v1238_v53 }
 0x12c   :  { %v1246_v60 = vpop.eup %974  ;;  %v429_v61 = vrot.slane %v428_v56, 1  ;;  %v407_v13 = vrot.slane %v1242_v58, 4  ;;  %v363_v42 = vmul.f32 1.442695, %v338_v30  ;;  %v485_v43 = vor.u32 1.1754944e-38, %v484_v31 }
 0x12d   :  { %v1248_v63 = vpop.eup %976  ;;  %v453_v12 = vrot.slane %v452_v62, 1  ;;  %v455_v21 = vrot.slane %v1246_v60, 4  ;;  %vm483_vm7 = vcmp.eq.f32.partialorder %v482_v36, 8.507059e+37  ;;  %v545_v47 = vor.u32 1.1754944e-38, %v544_v22 }
 0x12e   :  { %v1250_v2 = vadd.f32 %v429_v61, %v428_v56  ;;  %v383_v16 = vrot.slane %v1248_v63, 4  ;;  %v408_v27 = vadd.f32 %v1242_v58, %v407_v13  ;;  %vm543_vm8 = vcmp.eq.f32.partialorder %v542_v37, 8.507059e+37 }
 0x12f   :  { %v979_v1 = vpop.eup %978  ;;  %v1260_v26 = vadd.f32 %v453_v12, %v452_v62  ;;  %v456_v32 = vadd.f32 %v1246_v60, %v455_v21  ;;  %v249_v61 = vrot.slane %v248_v50, 1 }
 0x130   :  { %v981_v9 = vpop.eup %980  ;;  %v474_v10 = vmul.f32 %v979_v1, %v1235_v51  ;;  %982 = vrcp.f32 %v1250_v2  ;;  %vm479_vm1 = vweird.f32 %v979_v1  ;;  %v384_v29 = vadd.f32 %v1248_v63, %v383_v16 }
 0x131   :  { %v534_v11 = vmul.f32 %v981_v9, %v1238_v53  ;;  %vm539_vm2 = vweird.f32 %v981_v9  ;;  %vm480_vm5 = vmor %vm478_vm3, %vm479_vm1  ;;  %984 = vrcp.f32 %v1260_v26  ;;  %v409_v19 = vrot.slane %v408_v27, 2 }
 0x132   :  { %v475_v14 = vsub.f32 1.0, %v474_v10  ;;  %v385_v40 = vrot.slane %v384_v29, 2  ;;  %vm540_vm6 = vmor %vm538_vm4, %vm539_vm2  ;;  %v457_v45 = vrot.slane %v456_v32, 2  ;;  %986 = vpow2.f32 %v363_v42 }
 0x133   :  { %v535_v18 = vsub.f32 1.0, %v534_v11  ;;  %v410_v49 = vadd.f32 %v409_v19, %v408_v27  ;;  %vm598_vm10 = vweird.f32 %v1250_v2  ;;  %vm658_vm13 = vweird.f32 %v1260_v26 }
 0x134   :  { %v476_v24 = vmul.f32 %v979_v1, %v475_v14  ;;  %v386_v51 = vadd.f32 %v385_v40, %v384_v29  ;;  %v458_v55 = vadd.f32 %v457_v45, %v456_v32  ;;  %v269_v14 = vrot.slane %v1283_v3, 4  ;;  %v1326_v40 = vpop.xlane.xlu2 %216 }
 0x135   :  { %v536_v25 = vmul.f32 %v981_v9, %v535_v18  ;;  %v411_v57 = vrot.slane %v410_v49, 1  ;;  %v662_v32 = vand.u32 2147483647, %v1260_v26 }
 0x136   :  { %v477_v28 = vadd.f32 %v979_v1, %v476_v24  ;;  %v1267_v34 = vpop.eup %982  ;;  %v459_v10 = vrot.slane %v458_v55, 1  ;;  %v602_v24 = vand.u32 2147483647, %v1250_v2  ;;  %v270_v27 = vmax.f32 %v1283_v3, %v269_v14 }
 0x137   :  { %v537_v35 = vadd.f32 %v981_v9, %v536_v25  ;;  %v594_v44 = vmul.f32 %v1267_v34, %v1250_v2  ;;  %v1277_v52 = vpop.eup %984  ;;  %v1289_v13 = vadd.f32 %v411_v57, %v410_v49  ;;  %vm599_vm9 = vweird.f32 %v1267_v34 }
 0x138   :  { %v481_v39 = vsel %vm480_vm5, %v979_v1, %v477_v28  ;;  %v654_v0 = vmul.f32 %v1277_v52, %v1260_v26  ;;  %v387_v1 = vrot.slane %v386_v51, 1  ;;  %v1286_v11 = vpop.eup %986  ;;  %v1297_v21 = vadd.f32 %v459_v10, %v458_v55  ;;  %v1308_v28 = vpop.xlane.xlu1 %219  ;;  %vm1311_vm11 = vmor %vm598_vm10, %vm599_vm9 }
 0x139   :  { %v541_v46 = vsel %vm540_vm6, %v981_v9, %v537_v35  ;;  %v486_v48 = vsel %vm483_vm7, %v485_v43, %v481_v39  ;;  %v595_v54 = vsub.f32 1.0, %v594_v44  ;;  %v431_v23 = vrot.slane %v1286_v11, 4  ;;  %v1342_v55 = vpop.xlane.xlu0 %195 }
 0x13a   :  { %v546_v53 = vsel %vm543_vm8, %v545_v47, %v541_v46  ;;  %v487_v56 = vmul.f32 %v1216_v15, %v486_v48  ;;  %v250_v15 = vmax.f32 %v248_v50, %v249_v61  ;;  %v655_v16 = vsub.f32 1.0, %v654_v0 }
 0x13b   :  { %v547_v62 = vmul.f32 %v1220_v20, %v546_v53  ;;  %v596_v9 = vmul.f32 %v1267_v34, %v595_v54  ;;  %v1293_v17 = vadd.f32 %v387_v1, %v386_v51  ;;  %v604_v25 = vand.u32 2147483648, %v1250_v2 }
 0x13c   :  { %v713_v12 = vmul.f32 %v487_v56, %v1103_v4  ;;  %v656_v31 = vmul.f32 %v1277_v52, %v655_v16  ;;  %v664_v2 = vand.u32 2147483648, %v1260_v26  ;;  %v432_v35 = vadd.f32 %v1286_v11, %v431_v23 }
 0x13d   :  { %v717_v20 = vmul.f32 %v547_v62, %v1108_v5  ;;  %v597_v18 = vadd.f32 %v1267_v34, %v596_v9  ;;  %988 = vrcp.f32 %v1293_v17  ;;  %v331_v5 = vsub.f32 %v1244_v59, %v250_v15 }
 0x13e   :  { %v729_v4 = vsel %vm35_vm0, %v713_v12, 0.0  ;;  %990 = vrcp.f32 %v1289_v13  ;;  %vm603_vm12 = vcmp.eq.f32.partialorder %v602_v24, 8.507059e+37  ;;  %v605_v36 = vor.u32 1.1754944e-38, %v604_v25 }
 0x13f   :  { %v757_v29 = vsel %vm35_vm0, %v717_v20, 0.0  ;;  %v730_v33 = vrot.slane %v729_v4, 4  ;;  %v601_v59 = vsel %vm1311_vm11, %v1267_v34, %v597_v18  ;;  %992 = vrcp.f32 %v1297_v21 }
 0x140   :  { %vm659_vm14 = vweird.f32 %v1277_v52  ;;  %v758_v22 = vrot.slane %v757_v29, 4  ;;  %v679_v19 = vand.u32 2147483648, %v1297_v21  ;;  %v433_v37 = vrot.slane %v432_v35, 2  ;;  %v1368_v16 = vpop.xlane.xlu1 %228 }
 0x141   :  { %v349_v39 = vmul.f32 1.442695, %v331_v5  ;;  %v606_v34 = vsel %vm603_vm12, %v605_v36, %v601_v59  ;;  %v657_v43 = vadd.f32 %v1277_v52, %v656_v31  ;;  %v271_v44 = vrot.slane %v270_v27, 2  ;;  %vm1353_vm1 = vmor %vm658_vm13, %vm659_vm14 }
 0x142   :  { %v299_v45 = vrot.slane %v1308_v28, 4  ;;  %v731_v47 = vadd.f32 %v730_v33, %v729_v4  ;;  %vm1334_vm15 = vcmp.eq.f32.partialorder %v662_v32, 8.507059e+37  ;;  %v665_v49 = vor.u32 1.1754944e-38, %v664_v2 }
 0x143   :  { %v1328_v42 = vpop.eup %988  ;;  %v677_v50 = vand.u32 2147483647, %v1297_v21  ;;  %v557_v51 = vand.u32 2147483647, %v1289_v13  ;;  %994 = vpow2.f32 %v349_v39  ;;  %v272_v54 = vmax.f32 %v270_v27, %v271_v44 }
 0x144   :  { %v1332_v46 = vpop.eup %990  ;;  %v489_v53 = vmul.f32 %v1328_v42, %v1293_v17  ;;  %v1346_v57 = vadd.f32 %v758_v22, %v757_v29  ;;  %v607_v61 = vmul.f32 %v1228_v38, %v606_v34  ;;  %v1357_v0 = vor.u32 1.1754944e-38, %v679_v19  ;;  %v1385_v22 = vpop.xlane.xlu2 %207 }
 0x145   :  { %v1344_v56 = vpop.eup %992  ;;  %v434_v1 = vadd.f32 %v433_v37, %v432_v35  ;;  %v661_v9 = vsel %vm1353_vm1, %v1277_v52, %v657_v43  ;;  %v549_v10 = vmul.f32 %v1332_v46, %v1289_v13  ;;  %v273_v12 = vrot.slane %v272_v54, 1 }
 0x146   :  { %v300_v38 = vmax.f32 %v1308_v28, %v299_v45  ;;  %v732_v15 = vrot.slane %v731_v47, 2  ;;  %v559_v26 = vand.u32 2147483648, %v1289_v13  ;;  %v293_v14 = vrot.slane %v1326_v40, 4 }
 0x147   :  { %v251_v20 = vrot.slane %v1342_v55, 4  ;;  %v669_v18 = vmul.f32 %v1344_v56, %v1297_v21  ;;  %v490_v23 = vsub.f32 1.0, %v489_v53  ;;  %v274_v52 = vmax.f32 %v272_v54, %v273_v12 }
 0x148   :  { %v301_v4 = vrot.slane %v300_v38, 2  ;;  %v760_v24 = vrot.slane %v1346_v57, 2  ;;  %v666_v25 = vsel %vm1334_vm15, %v665_v49, %v661_v9  ;;  %v435_v5 = vrot.slane %v434_v1, 1 }
 0x149   :  { %v294_v27 = vmax.f32 %v1326_v40, %v293_v14  ;;  %v1376_v29 = vpop.eup %994  ;;  %v721_v30 = vmul.f32 %v607_v61, %v1113_v6  ;;  %v550_v31 = vsub.f32 1.0, %v549_v10  ;;  %v252_v32 = vmax.f32 %v1342_v55, %v251_v20 }
 0x14a   :  { %v317_v2 = vrot.slane %v1368_v16, 4  ;;  %v1381_v33 = vadd.f32 %v732_v15, %v731_v47  ;;  %v389_v59 = vrot.slane %v1376_v29, 4  ;;  %v335_v35 = vsub.f32 %v1283_v3, %v274_v52 }
 0x14b   :  { %v302_v36 = vmax.f32 %v300_v38, %v301_v4  ;;  %v1388_v19 = vmul.f32 %v1230_v41, %v666_v25  ;;  %v670_v37 = vsub.f32 1.0, %v669_v18  ;;  %v491_v6 = vmul.f32 %v1328_v42, %v490_v23 }
 0x14c   :  { %v295_v39 = vrot.slane %v294_v27, 2  ;;  %v1391_v34 = vadd.f32 %v435_v5, %v434_v1  ;;  %v390_v43 = vadd.f32 %v1376_v29, %v389_v59  ;;  %v357_v44 = vmul.f32 1.442695, %v335_v35 }
 0x14d   :  { %v303_v45 = vrot.slane %v302_v36, 1  ;;  %vm554_vm2 = vweird.f32 %v1332_v46  ;;  %v253_v3 = vrot.slane %v252_v32, 2  ;;  %v318_v48 = vmax.f32 %v1368_v16, %v317_v2 }
 0x14e   :  { %v296_v47 = vmax.f32 %v294_v27, %v295_v39  ;;  %v275_v49 = vrot.slane %v1385_v22, 4  ;;  %v551_v41 = vmul.f32 %v1332_v46, %v550_v31  ;;  %v391_v53 = vrot.slane %v390_v43, 2 }
 0x14f   :  { %996 = vpow2.f32 %v357_v44  ;;  %v304_v54 = vmax.f32 %v302_v36, %v303_v45  ;;  %vm553_vm3 = vweird.f32 %v1289_v13  ;;  %v254_v62 = vmax.f32 %v252_v32, %v253_v3 }
 0x150   :  { %v297_v61 = vrot.slane %v296_v47, 1  ;;  %v319_v1 = vrot.slane %v318_v48, 2  ;;  %v276_v9 = vmax.f32 %v1385_v22, %v275_v49  ;;  %v671_v10 = vmul.f32 %v1344_v56, %v670_v37  ;;  %vm1449_vm12 = vmor %vm553_vm3, %vm554_vm2 }
 0x151   :  { %vm674_vm4 = vweird.f32 %v1344_v56  ;;  %v492_v12 = vadd.f32 %v1328_v42, %v491_v6  ;;  %vm494_vm5 = vweird.f32 %v1328_v42  ;;  %v392_v38 = vadd.f32 %v391_v53, %v390_v43 }
 0x152   :  { %998 = vrcp.f32 %v1391_v34  ;;  %v340_v15 = vsub.f32 %v1308_v28, %v304_v54  ;;  %v298_v14 = vmax.f32 %v296_v47, %v297_v61  ;;  %v255_v20 = vrot.slane %v254_v62, 1 }
 0x153   :  { %vm673_vm6 = vweird.f32 %v1297_v21  ;;  %v499_v18 = vand.u32 2147483648, %v1293_v17  ;;  %v393_v23 = vrot.slane %v392_v38, 1  ;;  %v320_v52 = vmax.f32 %v318_v48, %v319_v1 }
 0x154   :  { %v277_v4 = vrot.slane %v276_v9, 2  ;;  %vm493_vm7 = vweird.f32 %v1293_v17  ;;  %v497_v25 = vand.u32 2147483647, %v1293_v17  ;;  %v367_v5 = vmul.f32 1.442695, %v340_v15  ;;  %vm1473_vm13 = vmor %vm673_vm6, %vm674_vm4 }
 0x155   :  { %v339_v27 = vsub.f32 %v1326_v40, %v298_v14  ;;  %v1411_v31 = vpop.eup %996  ;;  %v552_v28 = vadd.f32 %v1332_v46, %v551_v41  ;;  %vm1416_vm8 = vcmp.eq.f32.partialorder %v557_v51, 8.507059e+37  ;;  %vm1422_vm9 = vmor %vm493_vm7, %vm494_vm5  ;;  %v1426_v17 = vadd.f32 %v393_v23, %v392_v38 }
 0x156   :  { %v256_v59 = vmax.f32 %v254_v62, %v255_v20  ;;  %v321_v40 = vrot.slane %v320_v52, 1  ;;  %v496_v35 = vsel %vm1422_vm9, %v1328_v42, %v492_v12  ;;  %v413_v36 = vrot.slane %v1411_v31, 4 }
 0x157   :  { %1000 = vpow2.f32 %v367_v5  ;;  %v365_v51 = vmul.f32 1.442695, %v339_v27  ;;  %v785_v37 = vsel %vm35_vm0, %v721_v30, 0.0  ;;  %v500_v6 = vor.u32 1.1754944e-38, %v499_v18 }
 0x158   :  { %1002 = vrcp.f32 %v1426_v17  ;;  %v278_v39 = vmax.f32 %v276_v9, %v277_v4  ;;  %v1434_v43 = vpop.eup %998  ;;  %v734_v44 = vrot.slane %v1381_v33, 1  ;;  %vm498_vm10 = vcmp.eq.f32.partialorder %v497_v25, 8.507059e+37 }
 0x159   :  { %v414_v45 = vadd.f32 %v1411_v31, %v413_v36  ;;  %1004 = vpow2.f32 %v365_v51  ;;  %v672_v42 = vadd.f32 %v1344_v56, %v671_v10  ;;  %vm1441_vm11 = vcmp.eq.f32.partialorder %v677_v50, 8.507059e+37 }
 0x15a   :  { %v501_v3 = vsel %vm498_vm10, %v500_v6, %v496_v35  ;;  %v332_v48 = vsub.f32 %v1342_v55, %v256_v59  ;;  %v322_v49 = vmax.f32 %v320_v52, %v321_v40  ;;  %v786_v41 = vrot.slane %v785_v37, 4  ;;  %v1508_v40 = vpop.xlane.xlu0 %231 }
 0x15b   :  { %v556_v50 = vsel %vm1449_vm12, %v1332_v46, %v552_v28  ;;  %v560_v53 = vor.u32 1.1754944e-38, %v559_v26  ;;  %v415_v54 = vrot.slane %v414_v45, 2  ;;  %v609_v61 = vmul.f32 %v1434_v43, %v1391_v34 }
 0x15c   :  { %v351_v62 = vmul.f32 1.442695, %v332_v48  ;;  %v343_v1 = vsub.f32 %v1368_v16, %v322_v49  ;;  %v279_v9 = vrot.slane %v278_v39, 1  ;;  %v1465_v55 = vadd.f32 %v734_v44, %v1381_v33 }
 0x15d   :  { %v1462_v10 = vpop.eup %1000  ;;  %v725_v12 = vmul.f32 %v1388_v19, %v1118_v7  ;;  %v502_v46 = vmul.f32 %v1248_v63, %v501_v3  ;;  %v416_v26 = vadd.f32 %v415_v54, %v414_v45  ;;  %v676_v33 = vsel %vm1473_vm13, %v1344_v56, %v672_v42 }
 0x15e   :  { %v1478_v16 = vpop.eup %1002  ;;  %v443_v38 = vrot.slane %v1462_v10, 4  ;;  %1006 = vpow2.f32 %v351_v62  ;;  %v373_v7 = vmul.f32 1.442695, %v343_v1  ;;  %v561_v21 = vsel %vm1416_vm8, %v560_v53, %v556_v50 }
 0x15f   :  { %v1484_v19 = vpop.eup %1004  ;;  %v504_v15 = vmul.f32 %v1478_v16, %v1426_v17  ;;  %v417_v63 = vrot.slane %v416_v26, 1  ;;  %v280_v14 = vmax.f32 %v278_v39, %v279_v9  ;;  %v610_v20 = vsub.f32 1.0, %v609_v61 }
 0x160   :  { %v444_v18 = vadd.f32 %v1462_v10, %v443_v38  ;;  %v437_v23 = vrot.slane %v1484_v19, 4  ;;  %1008 = vpow2.f32 %v373_v7  ;;  %v714_v56 = vmul.f32 %v502_v46, %v1131_v8 }
 0x161   :  { %v505_v52 = vsub.f32 1.0, %v504_v15  ;;  %v1493_v4 = vadd.f32 %v417_v63, %v416_v26  ;;  %v336_v25 = vsub.f32 %v1385_v22, %v280_v14  ;;  %v1496_v5 = vadd.f32 %v786_v41, %v785_v37 }
 0x162   :  { %v1499_v27 = vsel %vm35_vm0, %v725_v12, 0.0  ;;  %v445_v28 = vrot.slane %v444_v18, 2  ;;  %v438_v32 = vadd.f32 %v1484_v19, %v437_v23  ;;  %v681_v2 = vsel %vm1441_vm11, %v1357_v0, %v676_v33 }
 0x163   :  { %v562_v59 = vmul.f32 %v1242_v58, %v561_v21  ;;  %v506_v8 = vmul.f32 %v1478_v16, %v505_v52  ;;  %1010 = vrcp.f32 %v1493_v4  ;;  %v611_v35 = vmul.f32 %v1434_v43, %v610_v20 }
 0x164   :  { %v1510_v22 = vpop.eup %1006  ;;  %v619_v36 = vand.u32 2147483648, %v1391_v34  ;;  %v446_v51 = vadd.f32 %v445_v28, %v444_v18  ;;  %v439_v37 = vrot.slane %v438_v32, 2  ;;  %v736_v6 = vsel %vm35_vm0, %v714_v56, 0.0 }
 0x165   :  { %vm614_vm14 = vweird.f32 %v1434_v43  ;;  %v395_v58 = vrot.slane %v1510_v22, 4  ;;  %v359_v0 = vmul.f32 1.442695, %v336_v25  ;;  %v514_v44 = vand.u32 2147483648, %v1426_v17 }
 0x166   :  { %v1517_v39 = vpop.eup %1008  ;;  %v447_v45 = vrot.slane %v446_v51, 1  ;;  %v440_v42 = vadd.f32 %v439_v37, %v438_v32  ;;  %v323_v47 = vrot.slane %v1508_v40, 4  ;;  %v507_v30 = vadd.f32 %v1478_v16, %v506_v8 }
 0x167   :  { %vm509_vm15 = vweird.f32 %v1478_v16  ;;  %v396_v3 = vadd.f32 %v1510_v22, %v395_v58  ;;  %v461_v48 = vrot.slane %v1517_v39, 4  ;;  %v612_v49 = vadd.f32 %v1434_v43, %v611_v35 }
 0x168   :  { %v1526_v41 = vadd.f32 %v447_v45, %v446_v51  ;;  %v441_v50 = vrot.slane %v440_v42, 1  ;;  %1012 = vpow2.f32 %v359_v0  ;;  %vm508_vm1 = vweird.f32 %v1426_v17 }
 0x169   :  { %v1528_v53 = vpop.eup %1010  ;;  %v512_v54 = vand.u32 2147483647, %v1426_v17  ;;  %v397_v61 = vrot.slane %v396_v3, 2  ;;  %v462_v62 = vadd.f32 %v1517_v39, %v461_v48  ;;  %vm613_vm2 = vweird.f32 %v1391_v34  ;;  %vm1534_vm3 = vmor %vm508_vm1, %vm509_vm15  ;;  %v1032_v48 = vld [vmem:[%s1783_s0 + $0x30] sm:$0xff] }
 0x16a   :  { %v564_v9 = vmul.f32 %v1528_v53, %v1493_v4  ;;  %1014 = vrcp.f32 %v1526_v41  ;;  %v324_v12 = vmax.f32 %v1508_v40, %v323_v47  ;;  %v737_v13 = vrot.slane %v736_v6, 4  ;;  %vm1548_vm4 = vmor %vm613_vm2, %vm614_vm14 }
 0x16b   :  { %v617_v46 = vand.u32 2147483647, %v1391_v34  ;;  %v511_v17 = vsel %vm1534_vm3, %v1478_v16, %v507_v30  ;;  %v515_v26 = vor.u32 1.1754944e-38, %v514_v44  ;;  %v1552_v7 = vadd.f32 %v441_v50, %v440_v42  ;;  %v1029_v42 = vld [vmem:[%s1783_s0 + $0x68] sm:$0xff] }
 0x16c   :  { %v565_v38 = vsub.f32 1.0, %v564_v9  ;;  %v398_v21 = vadd.f32 %v397_v61, %v396_v3  ;;  %v463_v15 = vrot.slane %v462_v62, 2  ;;  %v814_v63 = vrot.slane %v1499_v27, 4  ;;  %v1030_v61 = vld [vmem:[%s1783_s0 + $0x10] sm:$0xff] }
 0x16d   :  { %v616_v34 = vsel %vm1548_vm4, %v1434_v43, %v612_v49  ;;  %v620_v14 = vor.u32 1.1754944e-38, %v619_v36  ;;  %vm513_vm5 = vcmp.eq.f32.partialorder %v512_v54, 8.507059e+37  ;;  %1016 = vrcp.f32 %v1552_v7  ;;  %v1028_v43 = vld [vmem:[%s1783_s0 + $0x28] sm:$0xff] }
 0x16e   :  { %v1558_v16 = vpop.eup %1012  ;;  %v516_v20 = vsel %vm513_vm5, %v515_v26, %v511_v17  ;;  %v566_v18 = vmul.f32 %v1528_v53, %v565_v38  ;;  %v325_v23 = vrot.slane %v324_v12, 2  ;;  %v682_v56 = vmul.f32 %v1246_v60, %v681_v2  ;;  %v1031_v38 = vld [vmem:[%s1783_s0 + $0x48] sm:$0xff] }
 0x16f   :  { %vm618_vm6 = vcmp.eq.f32.partialorder %v617_v46, 8.507059e+37  ;;  %v399_v52 = vrot.slane %v398_v21, 1  ;;  %v464_v25 = vadd.f32 %v463_v15, %v462_v62  ;;  %v718_v32 = vmul.f32 %v1028_v43, %v562_v59 }
 0x170   :  { %v1563_v28 = vpop.eup %1014  ;;  %v738_v8 = vadd.f32 %v737_v13, %v736_v6  ;;  %v621_v35 = vsel %vm618_vm6, %v620_v14, %v616_v34  ;;  %v419_v36 = vrot.slane %v1558_v16, 4  ;;  %v517_v51 = vmul.f32 %v1376_v29, %v516_v20 }
 0x171   :  { %v567_v37 = vadd.f32 %v1528_v53, %v566_v18  ;;  %vm569_vm7 = vweird.f32 %v1528_v53  ;;  %v574_v60 = vand.u32 2147483648, %v1493_v4  ;;  %v639_v2 = vmul.f32 %v1563_v28, %v1526_v41 }
 0x172   :  { %v1575_v58 = vadd.f32 %v399_v52, %v398_v21  ;;  %v465_v0 = vrot.slane %v464_v25, 1  ;;  %v326_v44 = vmax.f32 %v324_v12, %v325_v23  ;;  %v788_v59 = vrot.slane %v1496_v5, 2 }
 0x173   :  { %vm568_vm8 = vweird.f32 %v1493_v4  ;;  %v572_v6 = vand.u32 2147483647, %v1493_v4  ;;  %v420_v29 = vadd.f32 %v1558_v16, %v419_v36  ;;  %v1581_v45 = vpop.eup %1016  ;;  %v1586_v47 = vmul.f32 %v1029_v42, %v682_v56 }
 0x174   :  { %v1589_v30 = vsel %vm35_vm0, %v718_v32, 0.0  ;;  %v739_v3 = vrot.slane %v738_v8, 2  ;;  %vm1593_vm9 = vmor %vm568_vm8, %vm569_vm7  ;;  %1018 = vrcp.f32 %v1575_v58  ;;  %v622_v4 = vmul.f32 %v1286_v11, %v621_v35 }
 0x175   :  { %v571_v49 = vsel %vm1593_vm9, %v1528_v53, %v567_v37  ;;  %v575_v50 = vor.u32 1.1754944e-38, %v574_v60  ;;  %v624_v54 = vmul.f32 %v1581_v45, %v1552_v7  ;;  %v715_v62 = vmul.f32 %v1030_v61, %v517_v51 }
 0x176   :  { %v640_v1 = vsub.f32 1.0, %v639_v2  ;;  %v1607_v9 = vadd.f32 %v465_v0, %v464_v25  ;;  %v327_v12 = vrot.slane %v326_v44, 1  ;;  %vm573_vm10 = vcmp.eq.f32.partialorder %v572_v6, 8.507059e+37 }
 0x177   :  { %v649_v11 = vand.u32 2147483648, %v1526_v41  ;;  %v625_v13 = vsub.f32 1.0, %v624_v54  ;;  %v421_v46 = vrot.slane %v420_v29, 2  ;;  %v765_v53 = vrot.slane %v1589_v30, 4 }
 0x178   :  { %v576_v17 = vsel %vm573_vm10, %v575_v50, %v571_v49  ;;  %v647_v26 = vand.u32 2147483647, %v1526_v41  ;;  %1020 = vrcp.f32 %v1607_v9  ;;  %v1613_v33 = vadd.f32 %v739_v3, %v738_v8 }
 0x179   :  { %v1618_v21 = vmul.f32 %v1031_v38, %v622_v4  ;;  %vm643_vm11 = vweird.f32 %v1526_v41  ;;  %v626_v15 = vmul.f32 %v1581_v45, %v625_v13  ;;  %v743_v14 = vsel %vm35_vm0, %v715_v62, 0.0 }
 0x17a   :  { %v1019_v34 = vpop.eup %1018  ;;  %v641_v20 = vmul.f32 %v1563_v28, %v640_v1  ;;  %v422_v18 = vadd.f32 %v421_v46, %v420_v29  ;;  %v328_v23 = vmax.f32 %v326_v44, %v327_v12  ;;  %v577_v56 = vmul.f32 %v1411_v31, %v576_v17 }
 0x17b   :  { %v650_v52 = vor.u32 1.1754944e-38, %v649_v11  ;;  %vm628_vm12 = vweird.f32 %v1552_v7  ;;  %v519_v25 = vmul.f32 %v1019_v34, %v1575_v58  ;;  %vm1627_vm13 = vcmp.eq.f32.partialorder %v647_v26, 8.507059e+37 }
 0x17c   :  { %v627_v32 = vadd.f32 %v1581_v45, %v626_v15  ;;  %vm629_vm14 = vweird.f32 %v1581_v45  ;;  %v423_v8 = vrot.slane %v422_v18, 1  ;;  %v344_v35 = vsub.f32 %v1508_v40, %v328_v23 }
 0x17d   :  { %vm644_vm15 = vweird.f32 %v1563_v28  ;;  %v632_v31 = vand.u32 2147483647, %v1552_v7  ;;  %v634_v36 = vand.u32 2147483648, %v1552_v7  ;;  %v520_v51 = vsub.f32 1.0, %v519_v25  ;;  %vm1645_vm1 = vmor %vm628_vm12, %vm629_vm14 }
 0x17e   :  { %v1637_v37 = vpop.eup %1020  ;;  %v642_v60 = vadd.f32 %v1563_v28, %v641_v20  ;;  %v529_v2 = vand.u32 2147483648, %v1575_v58  ;;  %v1641_v0 = vadd.f32 %v423_v8, %v422_v18  ;;  %v375_v44 = vmul.f32 1.442695, %v344_v35  ;;  %vm1663_vm3 = vmor %vm643_vm11, %vm644_vm15 }
 0x17f   :  { %v521_v6 = vmul.f32 %v1019_v34, %v520_v51  ;;  %vm524_vm2 = vweird.f32 %v1019_v34  ;;  %v527_v29 = vand.u32 2147483647, %v1575_v58  ;;  %v684_v42 = vmul.f32 %v1637_v37, %v1607_v9 }
 0x180   :  { %v744_v3 = vrot.slane %v743_v14, 4  ;;  %v719_v4 = vmul.f32 %v1032_v48, %v577_v56  ;;  %v631_v7 = vsel %vm1645_vm1, %v1581_v45, %v627_v32  ;;  %1022 = vrcp.f32 %v1641_v0 }
 0x181   :  { %v635_v50 = vor.u32 1.1754944e-38, %v634_v36  ;;  %v522_v54 = vadd.f32 %v1019_v34, %v521_v6  ;;  %vm523_vm4 = vweird.f32 %v1575_v58  ;;  %v685_v61 = vsub.f32 1.0, %v684_v42  ;;  %v1035_v42 = vld [vmem:[%s1783_s0 + $0x58] sm:$0xff] }
 0x182   :  { %v646_v62 = vsel %vm1663_vm3, %v1563_v28, %v642_v60  ;;  %vm633_vm5 = vcmp.eq.f32.partialorder %v632_v31, 8.507059e+37  ;;  %vm525_vm6 = vmor %vm523_vm4, %vm524_vm2  ;;  %v530_v45 = vor.u32 1.1754944e-38, %v529_v2  ;;  %1024 = vpow2.f32 %v375_v44 }
 0x183   :  { %v636_v1 = vsel %vm633_vm5, %v635_v50, %v631_v7  ;;  %v526_v41 = vsel %vm525_vm6, %v1019_v34, %v522_v54  ;;  %vm528_vm7 = vcmp.eq.f32.partialorder %v527_v29, 8.507059e+37  ;;  %v686_v12 = vmul.f32 %v1637_v37, %v685_v61 }
 0x184   :  { %v745_v11 = vadd.f32 %v744_v3, %v743_v14  ;;  %v771_v13 = vsel %vm35_vm0, %v719_v4, 0.0  ;;  %v531_v46 = vsel %vm528_vm7, %v530_v45, %v526_v41  ;;  %v692_v58 = vand.u32 2147483647, %v1607_v9 }
 0x185   :  { %v651_v17 = vsel %vm1627_vm13, %v650_v52, %v646_v62  ;;  %v532_v28 = vmul.f32 %v1510_v22, %v531_v46  ;;  %v687_v26 = vadd.f32 %v1637_v37, %v686_v12  ;;  %vm689_vm8 = vweird.f32 %v1637_v37  ;;  %v1033_v22 = vld [vmem:[%s1783_s0 + $0x18] sm:$0xff] }
 0x186   :  { %v1023_v38 = vpop.eup %1022  ;;  %v1683_v15 = vadd.f32 %v765_v53, %v1589_v30  ;;  %v741_v34 = vrot.slane %v1613_v33, 1  ;;  %v637_v14 = vmul.f32 %v1484_v19, %v636_v1  ;;  %v694_v20 = vand.u32 2147483648, %v1607_v9 }
 0x187   :  { %v792_v18 = vsel %vm35_vm0, %v1618_v21, 0.0  ;;  %v716_v23 = vmul.f32 %v1033_v22, %v532_v28  ;;  %vm688_vm9 = vweird.f32 %v1607_v9  ;;  %v579_v56 = vmul.f32 %v1023_v38, %v1641_v0 }
 0x188   :  { %v1695_v30 = vpop.eup %1024  ;;  %v746_v53 = vrot.slane %v745_v11, 2  ;;  %v772_v52 = vrot.slane %v771_v13, 4  ;;  %v652_v19 = vmul.f32 %v1462_v10, %v651_v17  ;;  %vm1700_vm10 = vmor %vm688_vm9, %vm689_vm8  ;;  %vm1704_vm11 = vcmp.eq.f32.partialorder %v692_v58, 8.507059e+37  ;;  %v1034_v10 = vld [vmem:[%s1783_s0 + $0x50] sm:$0xff] }
 0x189   :  { %v750_v9 = vsel %vm35_vm0, %v716_v23, 0.0  ;;  %v691_v43 = vsel %vm1700_vm10, %v1637_v37, %v687_v26  ;;  %v580_v32 = vsub.f32 1.0, %v579_v56  ;;  %v467_v8 = vrot.slane %v1695_v30, 4 }
 0x18a   :  { %v723_v35 = vmul.f32 %v1034_v10, %v637_v14  ;;  %v751_v31 = vrot.slane %v750_v9, 4  ;;  %v695_v36 = vor.u32 1.1754944e-38, %v694_v20  ;;  %v589_v51 = vand.u32 2147483648, %v1641_v0  ;;  %v1036_v14 = vld [vmem:[%s1783_s0 + $0x70] sm:$0xff] }
 0x18b   :  { %v581_v60 = vmul.f32 %v1023_v38, %v580_v32  ;;  %vm584_vm12 = vweird.f32 %v1023_v38  ;;  %v587_v2 = vand.u32 2147483647, %v1641_v0  ;;  %v468_v44 = vadd.f32 %v1695_v30, %v467_v8 }
 0x18c   :  { %v793_v40 = vrot.slane %v792_v18, 4  ;;  %v747_v37 = vadd.f32 %v746_v53, %v745_v11  ;;  %v752_v6 = vadd.f32 %v751_v31, %v750_v9  ;;  %v696_v29 = vsel %vm1704_vm11, %v695_v36, %v691_v43 }
 0x18d   :  { %v724_v3 = vmul.f32 %v1035_v42, %v652_v19  ;;  %v582_v48 = vadd.f32 %v1023_v38, %v581_v60  ;;  %vm583_vm13 = vweird.f32 %v1641_v0  ;;  %v469_v4 = vrot.slane %v468_v44, 2 }
 0x18e   :  { %v799_v7 = vsel %vm35_vm0, %v723_v35, 0.0  ;;  %v753_v49 = vrot.slane %v752_v6, 2  ;;  %vm585_vm14 = vmor %vm583_vm13, %vm584_vm12  ;;  %v590_v50 = vor.u32 1.1754944e-38, %v589_v51  ;;  %v773_v54 = vadd.f32 %v772_v52, %v771_v13 }
 0x18f   :  { %v697_v61 = vmul.f32 %v1517_v39, %v696_v29  ;;  %v586_v62 = vsel %vm585_vm14, %v1023_v38, %v582_v48  ;;  %vm588_vm15 = vcmp.eq.f32.partialorder %v587_v2, 8.507059e+37  ;;  %v470_v45 = vadd.f32 %v469_v4, %v468_v44 }
 0x190   :  { %v748_v1 = vrot.slane %v747_v37, 1  ;;  %v754_v41 = vadd.f32 %v753_v49, %v752_v6  ;;  %v591_v12 = vsel %vm588_vm15, %v590_v50, %v586_v62  ;;  %v761_v11 = vadd.f32 %v760_v24, %v1346_v57  ;;  %v1037_v57 = vld [vmem:[%s1783_s0 + $0x38] sm:$0xff] }
 0x191   :  { %v806_v0 = vsel %vm35_vm0, %v724_v3, 0.0  ;;  %v592_v46 = vmul.f32 %v1558_v16, %v591_v12  ;;  %v471_v58 = vrot.slane %v470_v45, 1  ;;  %v767_v17 = vrot.slane %v1683_v15, 2 }
 0x192   :  { %v742_v13 = vadd.f32 %v741_v34, %v1613_v33  ;;  %v800_v39 = vrot.slane %v799_v7, 4  ;;  %v755_v28 = vrot.slane %v754_v41, 1  ;;  %v774_v26 = vrot.slane %v773_v54, 2 }
 0x193   :  { %v794_v38 = vadd.f32 %v793_v40, %v792_v18  ;;  %v727_v20 = vmul.f32 %v1036_v14, %v697_v61  ;;  %v720_v24 = vmul.f32 %v1037_v57, %v592_v46  ;;  %v1740_v16 = vadd.f32 %v471_v58, %v470_v45 }
 0x194   :  { %v807_v22 = vrot.slane %v806_v0, 4  ;;  %v749_v23 = vadd.f32 %v748_v1, %v747_v37  ;;  %v762_v56 = vrot.slane %v761_v11, 1  ;;  %vm857_vm1 = vcmask 1041409  }
 0x195   :  { %1026 = vrcp.f32 %v1740_v16  ;;  %v756_v33 = vadd.f32 %v755_v28, %v754_v41  ;;  %v768_v34 = vadd.f32 %v767_v17, %v1683_v15  ;;  %vm859_vm2 = vcmask 1042434  }
 0x196   :  { %v801_v18 = vadd.f32 %v800_v39, %v799_v7  ;;  %v775_v53 = vadd.f32 %v774_v26, %v773_v54  ;;  %v778_v52 = vsel %vm35_vm0, %v720_v24, 0.0  ;;  %vm861_vm3 = vcmask 1043459  }
 0x197   :  { %v815_v19 = vadd.f32 %v814_v63, %v1499_v27  ;;  %v827_v25 = vsel %vm35_vm0, %v727_v20, 0.0  ;;  %v779_v21 = vrot.slane %v778_v52, 4  ;;  %v858_v9 = vsel %vm857_vm1, %v742_v13, %v1465_v55 }
 0x198   :  { %v820_v43 = vsel %vm35_vm0, %v1586_v47, 0.0  ;;  %v795_v15 = vrot.slane %v794_v38, 2  ;;  %v808_v32 = vadd.f32 %v807_v22, %v806_v0  ;;  %v860_v8 = vsel %vm859_vm2, %v749_v23, %v858_v9  ;;  %v1038_v22 = vld [vmem:[%s1783_s0 + $0x78] sm:$0xff]  ;;  %s1065_s0 = smov [#allocation2]  }
 0x199   :  { %v769_v10 = vrot.slane %v768_v34, 1  ;;  %v780_v35 = vadd.f32 %v779_v21, %v778_v52  ;;  %v862_v31 = vsel %vm861_vm3, %v756_v33, %v860_v8  ;;  %vm863_vm4 = vcmask 1044484   ;;  %s886_s19 = sshll.u32 %s1065_s0, 4  ;;  %s887_s19 = int_to_ptr.vmem [resolvable:$true] %s886_s19 }
 0x19a   :  { %v802_v36 = vrot.slane %v801_v18, 2  ;;  %v828_v27 = vrot.slane %v827_v25, 4  ;;  %v763_v63 = vadd.f32 %v762_v56, %v761_v11  ;;  %v776_v51 = vrot.slane %v775_v53, 1 }
 0x19b   :  { %v1027_v60 = vpop.eup %1026  ;;  %v789_v55 = vadd.f32 %v788_v59, %v1496_v5  ;;  %v816_v2 = vrot.slane %v815_v19, 2  ;;  %v781_v47 = vrot.slane %v780_v35, 2  ;;  %v821_v44 = vrot.slane %v820_v43, 4 }
 0x19c   :  { %v699_v40 = vmul.f32 %v1027_v60, %v1740_v16  ;;  %v864_v37 = vsel %vm863_vm4, %v763_v63, %v862_v31  ;;  %vm865_vm5 = vcmask 1045509   ;;  %v796_v6 = vadd.f32 %v795_v15, %v794_v38 }
 0x19d   :  { %v809_v29 = vrot.slane %v808_v32, 2  ;;  %v770_v42 = vadd.f32 %v769_v10, %v768_v34  ;;  %v782_v3 = vadd.f32 %v781_v47, %v780_v35  ;;  %v803_v48 = vadd.f32 %v802_v36, %v801_v18 }
 0x19e   :  { %v700_v4 = vsub.f32 1.0, %v699_v40  ;;  %v777_v7 = vadd.f32 %v776_v51, %v775_v53  ;;  %v829_v49 = vadd.f32 %v828_v27, %v827_v25  ;;  %v709_v50 = vand.u32 2147483648, %v1740_v16 }
 0x19f   :  { %v783_v54 = vrot.slane %v782_v3, 1  ;;  %v866_v5 = vsel %vm865_vm5, %v770_v42, %v864_v37  ;;  %vm867_vm6 = vcmask 1046534   ;;  %vm704_vm7 = vweird.f32 %v1027_v60 }
 0x1a0   :  { %v701_v59 = vmul.f32 %v1027_v60, %v700_v4  ;;  %v707_v61 = vand.u32 2147483647, %v1740_v16  ;;  %vm869_vm8 = vcmask 1047559   ;;  %v822_v62 = vadd.f32 %v821_v44, %v820_v43 }
 0x1a1   :  { %v797_v45 = vrot.slane %v796_v6, 1  ;;  %v810_v1 = vadd.f32 %v809_v29, %v808_v32  ;;  %v784_v41 = vadd.f32 %v783_v54, %v782_v3  ;;  %v804_v12 = vrot.slane %v803_v48, 1 }
 0x1a2   :  { %v702_v11 = vadd.f32 %v1027_v60, %v701_v59  ;;  %vm703_vm9 = vweird.f32 %v1740_v16  ;;  %v868_v0 = vsel %vm867_vm6, %v777_v7, %v866_v5  ;;  %v790_v46 = vrot.slane %v789_v55, 1 }
 0x1a3   :  { %vm705_vm10 = vmor %vm703_vm9, %vm704_vm7  ;;  %v710_v58 = vor.u32 1.1754944e-38, %v709_v50  ;;  %v870_v17 = vsel %vm869_vm8, %v784_v41, %v868_v0  ;;  %vm708_vm11 = vcmp.eq.f32.partialorder %v707_v61, 8.507059e+37  ;;  %v830_v39 = vrot.slane %v829_v49, 2 }
 0x1a4   :  { %v706_v13 = vsel %vm705_vm10, %v1027_v60, %v702_v11  ;;  %880 = vst.msk [vmem:[#allocation2] sm:$0xff] %vm35_vm0, %v870_v17  ;;  %v798_v28 = vadd.f32 %v797_v45, %v796_v6  ;;  %v811_v38 = vrot.slane %v810_v1, 1  ;;  %v823_v14 = vrot.slane %v822_v62, 2 }
 0x1a5   :  { %v711_v26 = vsel %vm708_vm11, %v710_v58, %v706_v13  ;;  %v805_v57 = vadd.f32 %v804_v12, %v803_v48  ;;  %v817_v24 = vadd.f32 %v816_v2, %v815_v19  ;;  %v791_v16 = vadd.f32 %v790_v46, %v789_v55 }
 0x1a6   :  { %v712_v20 = vmul.f32 %v1695_v30, %v711_v26  ;;  %v831_v56 = vadd.f32 %v830_v39, %v829_v49  ;;  %v812_v33 = vadd.f32 %v811_v38, %v810_v1  ;;  %v824_v34 = vadd.f32 %v823_v14, %v822_v62 }
 0x1a7   :  { %v871_v18 = vsel %vm857_vm1, %v798_v28, %v791_v16  ;;  %v818_v53 = vrot.slane %v817_v24, 1 }
 0x1a8   :  { %v728_v23 = vmul.f32 %v1038_v22, %v712_v20  ;;  %v872_v25 = vsel %vm859_vm2, %v805_v57, %v871_v18  ;;  %v832_v30 = vrot.slane %v831_v56, 1  ;;  %v825_v9 = vrot.slane %v824_v34, 1 }
 0x1a9   :  { %v873_v43 = vsel %vm861_vm3, %v812_v33, %v872_v25  ;;  %v819_v15 = vadd.f32 %v818_v53, %v817_v24 }
 0x1aa   :  { %v834_v52 = vsel %vm35_vm0, %v728_v23, 0.0  ;;  %v833_v8 = vadd.f32 %v832_v30, %v831_v56  ;;  %v826_v35 = vadd.f32 %v825_v9, %v824_v34 }
 0x1ab   :  { %v835_v21 = vrot.slane %v834_v52, 4  ;;  %v874_v10 = vsel %vm863_vm4, %v819_v15, %v873_v43 }
 0x1ac   :  { %v875_v27 = vsel %vm865_vm5, %v826_v35, %v874_v10 }
 0x1ad   :  { %v836_v19 = vadd.f32 %v835_v21, %v834_v52  ;;  %v876_v63 = vsel %vm867_vm6, %v833_v8, %v875_v27 }
 0x1af   :  { %v837_v32 = vrot.slane %v836_v19, 2 }
 0x1b1   :  { %v838_v31 = vadd.f32 %v837_v32, %v836_v19 }
 0x1b3   :  { %v839_v36 = vrot.slane %v838_v31, 1 }
 0x1b5   :  { %v840_v51 = vadd.f32 %v839_v36, %v838_v31 }
 0x1b7   :  { %v877_v60 = vsel %vm869_vm8, %v840_v51, %v876_v63 }
 0x1b8   :  { %881 = vst.msk [vmem:[#allocation2 + $0x8] sm:$0xff] %vm35_vm0, %v877_v60 }
 0x1b9   :  { %894 = dma.vmem_to_hbm [thread:$0]  %s887_s19, 256, %s889_s22, [#allocation3], %s1066_s23, %s1066_s23, %s1067_s24  }
 0x1ba   :  { %1063 = dma.done.wait [#allocation3], 256  }
 0x1bb   :  { %1064 = vsyncadd [#allocation3], 4294967040 }
 0x1bc   :  { %899 = vsyncpa [#allocation3], 1 }

</bundles_post_ra>
